<compile_context>
chip_gen: v6e
topology: v6e:2x2x1
jax: 0.10.0
libtpu: 0.0.40
codegen_flags: <defaults>
</compile_context>

<pallas_src>
import numpy as np
import jax
import jax.numpy as jnp
from jax.experimental import pallas as pl
from jax.experimental.pallas import tpu as pltpu


# ----------------------------------------------------------------------------- #
# Helpers
# ----------------------------------------------------------------------------- #
def _const_spec(shape):
    """Full-array block whose index does not change across the grid (resident)."""
    nd = len(shape)
    return pl.BlockSpec(shape, lambda r, _nd=nd: (0,) * _nd)


def _round_up(x, m):
    return ((x + m - 1) // m) * m


def _pick_row_tile(n_rows):
    """Row tile for streaming x: multiple of 8 (f32 sublane tile).
    Production N: 8192 rows (~1 MiB of x at E=32 f32 per buffer, comfortably
    double-buffered inside v7x's 64 MiB / 32 MiB scoped VMEM). Smaller N:
    at least 2 grid steps so the accumulate/mask path is pipelined."""
    if n_rows >= 16384:
        return 8192
    return max(8, _round_up(-(-n_rows // 2), 8))


def _row_to_col(row, n):
    """(1, n) -> (n, 1) lane->sublane move via broadcast + diagonal extract
    (plain VPU/XLU ops; avoids a tiny transpose). n is small (== base)."""
    sq = jnp.broadcast_to(row, (n, n))
    i = jax.lax.broadcasted_iota(jnp.int32, (n, n), 0)
    j = jax.lax.broadcasted_iota(jnp.int32, (n, n), 1)
    return jnp.sum(jnp.where(i == j, sq, 0.0), axis=1, keepdims=True)


# ----------------------------------------------------------------------------- #
# Fused kernel: fused two-head MLP + masked row-mean (folded through fc3)
#               + lane-dense sine synthesis
# ----------------------------------------------------------------------------- #
def make_periodic_kernel(n_rows, tile_rows, base):
    inv_n = 1.0 / float(n_rows)

    def kernel(x_ref, w1_ref, b1_ref, w2_ref, b2_ref,
               w3w_ref, b3w_ref, w3p_ref, b3p_ref,
               t_ref, freq_ref, mask_ref,
               pred_ref, wout_ref, pout_ref,
               acc_ref):
        r = pl.program_id(0)

        @pl.when(r == 0)
        def _init():
            acc_ref[...] = jnp.zeros_like(acc_ref)

        # --- fused fc1/fc2 for BOTH heads: one (TM, 2H) pass ----------------
        x = x_ref[...]                                                  # (TM, E)
        h1 = jnp.dot(x, w1_ref[...],
                     preferred_element_type=jnp.float32) + b1_ref[...]  # (TM, 2H)
        h1 = jnp.maximum(h1, 0.0)
        h2 = jnp.dot(h1, w2_ref[...],
                     preferred_element_type=jnp.float32) + b2_ref[...]  # (TM, 2H)
        h2 = jnp.maximum(h2, 0.0)

        # Mask rows past the true N (ragged last tile) before the row-sum.
        row = r * tile_rows + jax.lax.broadcasted_iota(
            jnp.int32, (tile_rows, 1), 0)                               # (TM, 1)
        h2 = jnp.where(row < n_rows, h2, 0.0)
        acc_ref[...] += jnp.sum(h2, axis=0, keepdims=True)              # (1, 2H)

        @pl.when(r == pl.num_programs(0) - 1)
        def _finalize():
            # Mean folded through fc3 (exact: fc3 is affine, mean is after it).
            # W3 per head is zero-padded to (2H, base) -> no lane slicing.
            mean_h2 = acc_ref[...] * inv_n                              # (1, 2H)
            w_row = jnp.dot(mean_h2, w3w_ref[...],
                            preferred_element_type=jnp.float32) + b3w_ref[...]
            p_row = jnp.dot(mean_h2, w3p_ref[...],
                            preferred_element_type=jnp.float32) + b3p_ref[...]
            wout_ref[...] = w_row                                       # (1, base)
            pout_ref[...] = p_row                                       # (1, base)

            # Lane-dense harmonic synthesis: (base, T) slab, harmonics on
            # sublanes, time on lanes; one sin + one sublane reduce -> (1, T).
            mw_col = _row_to_col(w_row * mask_ref[...], base)           # (base, 1)
            ph_col = _row_to_col(p_row, base)                           # (base, 1)
            arg = freq_ref[...] * t_ref[...] + ph_col                   # (base, T)
            pred_ref[...] = jnp.sum(mw_col * jnp.sin(arg),
                                    axis=0, keepdims=True)              # (1, T)

    return kernel


# ----------------------------------------------------------------------------- #
# One-time parameter restructuring (hoisted out of the per-call path)
# ----------------------------------------------------------------------------- #
def prepare_periodic_params(weight_params, phase_params, base, is_sim=False):
    w1w, b1w, w2w, b2w, w3w, b3w = weight_params
    w1p, b1p, w2p, b2p, w3p, b3p = phase_params
    H = w1w.shape[1]
    z_hh = jnp.zeros((H, H), w2w.dtype)
    z_hb = jnp.zeros((H, base), w3w.dtype)
    start = 0 if is_sim else 2
    return dict(
        w1=jnp.concatenate([w1w, w1p], axis=1),                         # (E, 2H)
        b1=jnp.concatenate([b1w, b1p], axis=1),                         # (1, 2H)
        w2=jnp.concatenate(
            [jnp.concatenate([w2w, z_hh], axis=1),
             jnp.concatenate([z_hh, w2p], axis=1)], axis=0),            # (2H, 2H)
        b2=jnp.concatenate([b2w, b2p], axis=1),                         # (1, 2H)
        w3w=jnp.concatenate([w3w, z_hb], axis=0),                       # (2H, base)
        b3w=b3w,                                                        # (1, base)
        w3p=jnp.concatenate([z_hb, w3p], axis=0),                       # (2H, base)
        b3p=b3p,                                                        # (1, base)
        freq=jnp.asarray([2.0 * np.pi / float(i + 1) for i in range(base)],
                         dtype=jnp.float32).reshape(base, 1),           # (base, 1)
        mask=jnp.asarray([1.0 if i >= start else 0.0 for i in range(base)],
                         dtype=jnp.float32).reshape(1, base),           # (1, base)
    )


# ----------------------------------------------------------------------------- #
# Periodic forward wrapper
# ----------------------------------------------------------------------------- #
def periodic_forward(x, timestamps, params, base):
    """Mirrors Periodic.forward. Returns (pred, weights, base, phases)."""
    B, L, E = x.shape
    N = B * L
    num, length = timestamps.shape
    T = num * length
    H2 = params["w1"].shape[1]          # 2 * hidden

    x2d = x.reshape(N, E)
    t_row = timestamps.reshape(1, T).astype(jnp.float32)

    TM = _pick_row_tile(N)
    R = pl.cdiv(N, TM)

    pred_row, w_row, p_row = pl.pallas_call(
        make_periodic_kernel(N, TM, base),
        out_shape=(
            jax.ShapeDtypeStruct((1, T), jnp.float32),
            jax.ShapeDtypeStruct((1, base), jnp.float32),
            jax.ShapeDtypeStruct((1, base), jnp.float32),
        ),
        grid=(R,),
        in_specs=[
            # x streams over row tiles (default double-buffered; bump to
            # pipeline_mode=pl.Buffered(3) if profiling shows exposed DMA).
            pl.BlockSpec((TM, E), lambda r: (r, 0)),
            _const_spec((E, H2)), _const_spec((1, H2)),
            _const_spec((H2, H2)), _const_spec((1, H2)),
            _const_spec((H2, base)), _const_spec((1, base)),
            _const_spec((H2, base)), _const_spec((1, base)),
            _const_spec((1, T)),
            _const_spec((base, 1)), _const_spec((1, base)),
        ],
        out_specs=(
            _const_spec((1, T)),
            _const_spec((1, base)),
            _const_spec((1, base)),
        ),
        scratch_shapes=[pltpu.VMEM((1, H2), jnp.float32)],
        compiler_params=pltpu.CompilerParams(
            # Row axis carries the mean accumulator -> reduction ("arbitrary").
            dimension_semantics=("arbitrary",)),
    )(x2d, params["w1"], params["b1"], params["w2"], params["b2"],
      params["w3w"], params["b3w"], params["w3p"], params["b3p"],
      t_row, params["freq"], params["mask"])

    pred = pred_row.reshape(num, length)
    return pred, w_row[0], base, p_row[0]


# ----------------------------------------------------------------------------- #
def init_mlp_params(key, input_dim, hidden, output_dim):
    """(in, out) weight layout + (1, out) bias rows (== torch's W.T, b)."""
    k1, k2, k3, k4, k5, k6 = jax.random.split(key, 6)
    scale = 0.1
    w1 = scale * jax.random.normal(k1, (input_dim, hidden), jnp.float32)
    b1 = scale * jax.random.normal(k2, (1, hidden), jnp.float32)
    w2 = scale * jax.random.normal(k3, (hidden, hidden), jnp.float32)
    b2 = scale * jax.random.normal(k4, (1, hidden), jnp.float32)
    w3 = scale * jax.random.normal(k5, (hidden, output_dim), jnp.float32)
    b3 = scale * jax.random.normal(k6, (1, output_dim), jnp.float32)
    return (w1, b1, w2, b2, w3, b3)


def generate_timestamps(num, length, start, granularity):
    t = [[start + i * granularity + shift * granularity for i in range(length)]
         for shift in range(num)]
    return jnp.asarray(t, dtype=jnp.float32)


# ----------------------------------------------------------------------------- #
if __name__ == "__main__":
    # Small config consistent with the module: embed_size = hidden = 32,
    # base = 8, input_len = 8 (sequence length), batch = 2, timestamps (4, 16).
    B, L, E = 2, 8, 32
    HIDDEN = E
    BASE = 8
    NUM, LENGTH = 4, 16

    key = jax.random.PRNGKey(0)
    kx, kw, kp = jax.random.split(key, 3)

    x = jax.random.normal(kx, (B, L, E), jnp.float32)
    timestamps = generate_timestamps(NUM, LENGTH, start=0.0, granularity=1.0)

    weight_params = init_mlp_params(kw, E, HIDDEN, BASE)
    phase_params = init_mlp_params(kp, E, HIDDEN, BASE)

    # One-time parameter restructuring (fused / block-diagonal layouts).
    params = prepare_periodic_params(weight_params, phase_params, BASE, is_sim=False)

    pred, weights, base_out, phases = periodic_forward(x, timestamps, params, BASE)
    jax.block_until_ready((pred, weights, phases))

    # Pure-JAX reference check for correctness (mirrors the torch module).
    def mlp_ref(x2d, p):
        w1, b1, w2, b2, w3, b3 = p
        h = jnp.maximum(x2d @ w1 + b1, 0.0)
        h = jnp.maximum(h @ w2 + b2, 0.0)
        return h @ w3 + b3

    x2d = x.reshape(B * L, E)
    w_ref = jnp.mean(mlp_ref(x2d, weight_params), axis=0)
    p_ref = jnp.mean(mlp_ref(x2d, phase_params), axis=0)
    pred_ref = jnp.zeros_like(timestamps)
    for i in range(2, BASE):
        pred_ref = pred_ref + w_ref[i] * jnp.sin(
            2.0 * np.pi / (i + 1) * timestamps + p_ref[i])

    np.testing.assert_allclose(np.asarray(weights), np.asarray(w_ref), rtol=1e-4, atol=1e-5)
    np.testing.assert_allclose(np.asarray(phases), np.asarray(p_ref), rtol=1e-4, atol=1e-5)
    np.testing.assert_allclose(np.asarray(pred), np.asarray(pred_ref), rtol=1e-4, atol=1e-5)
    assert base_out == BASE

    print("KERNEL_OK")
</pallas_src>

<mosaic_0001>
module attributes {stable_mosaic.version = 11 : i64} {
  func.func @kernel(%arg0: i32, %arg1: memref<8x32xf32, #tpu.memory_space<vmem>>, %arg2: memref<32x64xf32, #tpu.memory_space<vmem>>, %arg3: memref<1x64xf32, #tpu.memory_space<vmem>>, %arg4: memref<64x64xf32, #tpu.memory_space<vmem>>, %arg5: memref<1x64xf32, #tpu.memory_space<vmem>>, %arg6: memref<64x8xf32, #tpu.memory_space<vmem>>, %arg7: memref<1x8xf32, #tpu.memory_space<vmem>>, %arg8: memref<64x8xf32, #tpu.memory_space<vmem>>, %arg9: memref<1x8xf32, #tpu.memory_space<vmem>>, %arg10: memref<1x64xf32, #tpu.memory_space<vmem>>, %arg11: memref<8x1xf32, #tpu.memory_space<vmem>>, %arg12: memref<1x8xf32, #tpu.memory_space<vmem>>, %arg13: memref<1x64xf32, #tpu.memory_space<vmem>>, %arg14: memref<1x8xf32, #tpu.memory_space<vmem>>, %arg15: memref<1x8xf32, #tpu.memory_space<vmem>>, %arg16: memref<1x64xf32, #tpu.memory_space<vmem>>) attributes {dimension_semantics = [#tpu.dimension_semantics<arbitrary>], iteration_bounds = array<i64: 2>, scalar_prefetch = 0 : i64, scratch_operands = 1 : i64, tpu.core_type = #tpu.core_type<tc>, window_params = [{transform_indices = @transform_0, window_bounds = array<i64: 8, 32>}, {pipeline_mode = #tpu.pipeline_mode<synchronous>, transform_indices = @transform_1, window_bounds = array<i64: 32, 64>}, {pipeline_mode = #tpu.pipeline_mode<synchronous>, transform_indices = @transform_2, window_bounds = array<i64: 1, 64>}, {pipeline_mode = #tpu.pipeline_mode<synchronous>, transform_indices = @transform_3, window_bounds = array<i64: 64, 64>}, {pipeline_mode = #tpu.pipeline_mode<synchronous>, transform_indices = @transform_4, window_bounds = array<i64: 1, 64>}, {pipeline_mode = #tpu.pipeline_mode<synchronous>, transform_indices = @transform_5, window_bounds = array<i64: 64, 8>}, {pipeline_mode = #tpu.pipeline_mode<synchronous>, transform_indices = @transform_6, window_bounds = array<i64: 1, 8>}, {pipeline_mode = #tpu.pipeline_mode<synchronous>, transform_indices = @transform_7, window_bounds = array<i64: 64, 8>}, {pipeline_mode = #tpu.pipeline_mode<synchronous>, transform_indices = @transform_8, window_bounds = array<i64: 1, 8>}, {pipeline_mode = #tpu.pipeline_mode<synchronous>, transform_indices = @transform_9, window_bounds = array<i64: 1, 64>}, {pipeline_mode = #tpu.pipeline_mode<synchronous>, transform_indices = @transform_10, window_bounds = array<i64: 8, 1>}, {pipeline_mode = #tpu.pipeline_mode<synchronous>, transform_indices = @transform_11, window_bounds = array<i64: 1, 8>}, {pipeline_mode = #tpu.pipeline_mode<synchronous>, transform_indices = @transform_12, window_bounds = array<i64: 1, 64>}, {pipeline_mode = #tpu.pipeline_mode<synchronous>, transform_indices = @transform_13, window_bounds = array<i64: 1, 8>}, {pipeline_mode = #tpu.pipeline_mode<synchronous>, transform_indices = @transform_14, window_bounds = array<i64: 1, 8>}]} {
    %c0_i32 = arith.constant 0 : i32
    %0 = arith.cmpi eq, %arg0, %c0_i32 : i32
    %1 = arith.extui %0 : i1 to i32
    %c0_i32_0 = arith.constant 0 : i32
    %2 = arith.cmpi ne, %1, %c0_i32_0 : i32
    scf.if %2 {
      %cst_20 = arith.constant 0.000000e+00 : f32
      %36 = vector.broadcast %cst_20 : f32 to vector<1x64xf32>
      %c0_21 = arith.constant 0 : index
      %c0_22 = arith.constant 0 : index
      %37 = vector.load %arg16[%c0_21, %c0_22] : memref<1x64xf32, #tpu.memory_space<vmem>>, vector<1x64xf32>
      tpu.vector_store %arg16[%c0_21, %c0_22], %36 {strides = array<i32>} : memref<1x64xf32, #tpu.memory_space<vmem>>, vector<1x64xf32>,
    } else {
    }
    %c0 = arith.constant 0 : index
    %c0_1 = arith.constant 0 : index
    %3 = vector.load %arg1[%c0, %c0_1] : memref<8x32xf32, #tpu.memory_space<vmem>>, vector<8x32xf32>
    %c0_2 = arith.constant 0 : index
    %c0_3 = arith.constant 0 : index
    %4 = vector.load %arg2[%c0_2, %c0_3] : memref<32x64xf32, #tpu.memory_space<vmem>>, vector<32x64xf32>
    %cst = arith.constant dense<0.000000e+00> : vector<8x64xf32>
    %5 = tpu.matmul %3, %4, %cst {dimension_numbers = #tpu.dot_dimension_numbers<[1], [0], [0], [1], [0, 0, 1, 1], [], []>} : vector<8x32xf32>, vector<32x64xf32>, vector<8x64xf32> -> vector<8x64xf32>
    %c0_4 = arith.constant 0 : index
    %c0_5 = arith.constant 0 : index
    %6 = vector.load %arg3[%c0_4, %c0_5] : memref<1x64xf32, #tpu.memory_space<vmem>>, vector<1x64xf32>
    %7 = vector.broadcast %6 : vector<1x64xf32> to vector<8x64xf32>
    %8 = arith.addf %5, %7 : vector<8x64xf32>
    %cst_6 = arith.constant 0.000000e+00 : f32
    %9 = vector.broadcast %cst_6 : f32 to vector<8x64xf32>
    %10 = arith.maximumf %8, %9 : vector<8x64xf32>
    %c0_7 = arith.constant 0 : index
    %c0_8 = arith.constant 0 : index
    %11 = vector.load %arg4[%c0_7, %c0_8] : memref<64x64xf32, #tpu.memory_space<vmem>>, vector<64x64xf32>
    %cst_9 = arith.constant dense<0.000000e+00> : vector<8x64xf32>
    %12 = tpu.matmul %10, %11, %cst_9 {dimension_numbers = #tpu.dot_dimension_numbers<[1], [0], [0], [1], [0, 0, 1, 1], [], []>} : vector<8x64xf32>, vector<64x64xf32>, vector<8x64xf32> -> vector<8x64xf32>
    %c0_10 = arith.constant 0 : index
    %c0_11 = arith.constant 0 : index
    %13 = vector.load %arg5[%c0_10, %c0_11] : memref<1x64xf32, #tpu.memory_space<vmem>>, vector<1x64xf32>
    %14 = vector.broadcast %13 : vector<1x64xf32> to vector<8x64xf32>
    %15 = arith.addf %12, %14 : vector<8x64xf32>
    %cst_12 = arith.constant 0.000000e+00 : f32
    %16 = vector.broadcast %cst_12 : f32 to vector<8x64xf32>
    %17 = arith.maximumf %15, %16 : vector<8x64xf32>
    %c8_i32 = arith.constant 8 : i32
    %18 = arith.muli %arg0, %c8_i32 : i32
    %19 = tpu.iota {dimensions = array<i32: 0>} : vector<8x1xi32>
    %20 = vector.broadcast %18 : i32 to vector<8x1xi32>
    %21 = arith.addi %20, %19 : vector<8x1xi32>
    %c16_i32 = arith.constant 16 : i32
    %22 = vector.broadcast %c16_i32 : i32 to vector<8x1xi32>
    %23 = arith.cmpi slt, %21, %22 : vector<8x1xi32>
    %cst_13 = arith.constant 0.000000e+00 : f32
    %24 = vector.shape_cast %23 : vector<8x1xi1> to vector<8x1xi1>
    %25 = vector.broadcast %24 : vector<8x1xi1> to vector<8x64xi1>
    %26 = vector.broadcast %cst_13 : f32 to vector<8x64xf32>
    %27 = arith.select %25, %17, %26 : vector<8x64xi1>, vector<8x64xf32>
    %c0_14 = arith.constant 0 : index
    %c0_15 = arith.constant 0 : index
    %28 = vector.load %arg16[%c0_14, %c0_15] : memref<1x64xf32, #tpu.memory_space<vmem>>, vector<1x64xf32>
    %cst_16 = arith.constant dense<0.000000e+00> : vector<64xf32>
    %29 = vector.multi_reduction <add>, %27, %cst_16 [0] : vector<8x64xf32> to vector<64xf32>
    %30 = vector.shape_cast %29 : vector<64xf32> to vector<1x64xf32>
    %31 = arith.addf %28, %30 : vector<1x64xf32>
    %c0_17 = arith.constant 0 : index
    %c0_18 = arith.constant 0 : index
    %32 = vector.load %arg16[%c0_17, %c0_18] : memref<1x64xf32, #tpu.memory_space<vmem>>, vector<1x64xf32>
    tpu.vector_store %arg16[%c0_17, %c0_18], %31 {strides = array<i32>} : memref<1x64xf32, #tpu.memory_space<vmem>>, vector<1x64xf32>,
    %c1_i32 = arith.constant 1 : i32
    %33 = arith.cmpi eq, %arg0, %c1_i32 : i32
    %34 = arith.extui %33 : i1 to i32
    %c0_i32_19 = arith.constant 0 : i32
    %35 = arith.cmpi ne, %34, %c0_i32_19 : i32
    scf.if %35 {
      %c0_20 = arith.constant 0 : index
      %c0_21 = arith.constant 0 : index
      %36 = vector.load %arg16[%c0_20, %c0_21] : memref<1x64xf32, #tpu.memory_space<vmem>>, vector<1x64xf32>
      %cst_22 = arith.constant 6.250000e-02 : f32
      %37 = vector.broadcast %cst_22 : f32 to vector<1x64xf32>
      %38 = arith.mulf %36, %37 : vector<1x64xf32>
      %c0_23 = arith.constant 0 : index
      %c0_24 = arith.constant 0 : index
      %39 = vector.load %arg6[%c0_23, %c0_24] : memref<64x8xf32, #tpu.memory_space<vmem>>, vector<64x8xf32>
      %cst_25 = arith.constant dense<0.000000e+00> : vector<1x8xf32>
      %40 = tpu.matmul %38, %39, %cst_25 {dimension_numbers = #tpu.dot_dimension_numbers<[1], [0], [0], [1], [0, 0, 1, 1], [], []>} : vector<1x64xf32>, vector<64x8xf32>, vector<1x8xf32> -> vector<1x8xf32>
      %c0_26 = arith.constant 0 : index
      %c0_27 = arith.constant 0 : index
      %41 = vector.load %arg7[%c0_26, %c0_27] : memref<1x8xf32, #tpu.memory_space<vmem>>, vector<1x8xf32>
      %42 = arith.addf %40, %41 : vector<1x8xf32>
      %c0_28 = arith.constant 0 : index
      %c0_29 = arith.constant 0 : index
      %43 = vector.load %arg8[%c0_28, %c0_29] : memref<64x8xf32, #tpu.memory_space<vmem>>, vector<64x8xf32>
      %cst_30 = arith.constant dense<0.000000e+00> : vector<1x8xf32>
      %44 = tpu.matmul %38, %43, %cst_30 {dimension_numbers = #tpu.dot_dimension_numbers<[1], [0], [0], [1], [0, 0, 1, 1], [], []>} : vector<1x64xf32>, vector<64x8xf32>, vector<1x8xf32> -> vector<1x8xf32>
      %c0_31 = arith.constant 0 : index
      %c0_32 = arith.constant 0 : index
      %45 = vector.load %arg9[%c0_31, %c0_32] : memref<1x8xf32, #tpu.memory_space<vmem>>, vector<1x8xf32>
      %46 = arith.addf %44, %45 : vector<1x8xf32>
      %c0_33 = arith.constant 0 : index
      %c0_34 = arith.constant 0 : index
      %47 = vector.load %arg14[%c0_33, %c0_34] : memref<1x8xf32, #tpu.memory_space<vmem>>, vector<1x8xf32>
      tpu.vector_store %arg14[%c0_33, %c0_34], %42 {strides = array<i32>} : memref<1x8xf32, #tpu.memory_space<vmem>>, vector<1x8xf32>,
      %c0_35 = arith.constant 0 : index
      %c0_36 = arith.constant 0 : index
      %48 = vector.load %arg15[%c0_35, %c0_36] : memref<1x8xf32, #tpu.memory_space<vmem>>, vector<1x8xf32>
      tpu.vector_store %arg15[%c0_35, %c0_36], %46 {strides = array<i32>} : memref<1x8xf32, #tpu.memory_space<vmem>>, vector<1x8xf32>,
      %c0_37 = arith.constant 0 : index
      %c0_38 = arith.constant 0 : index
      %49 = vector.load %arg12[%c0_37, %c0_38] : memref<1x8xf32, #tpu.memory_space<vmem>>, vector<1x8xf32>
      %50 = arith.mulf %42, %49 : vector<1x8xf32>
      %51 = vector.shape_cast %50 : vector<1x8xf32> to vector<1x8xf32>
      %52 = vector.broadcast %51 : vector<1x8xf32> to vector<8x8xf32>
      %53 = tpu.iota {dimensions = array<i32: 0>} : vector<8x8xi32>
      %54 = tpu.iota {dimensions = array<i32: 1>} : vector<8x8xi32>
      %55 = arith.cmpi eq, %53, %54 : vector<8x8xi32>
      %cst_39 = arith.constant 0.000000e+00 : f32
      %56 = vector.broadcast %cst_39 : f32 to vector<8x8xf32>
      %57 = arith.select %55, %52, %56 : vector<8x8xi1>, vector<8x8xf32>
      %cst_40 = arith.constant dense<0.000000e+00> : vector<8xf32>
      %58 = vector.multi_reduction <add>, %57, %cst_40 [1] : vector<8x8xf32> to vector<8xf32>
      %59 = vector.shape_cast %58 : vector<8xf32> to vector<8x1xf32>
      %60 = vector.shape_cast %46 : vector<1x8xf32> to vector<1x8xf32>
      %61 = vector.broadcast %60 : vector<1x8xf32> to vector<8x8xf32>
      %62 = tpu.iota {dimensions = array<i32: 0>} : vector<8x8xi32>
      %63 = tpu.iota {dimensions = array<i32: 1>} : vector<8x8xi32>
      %64 = arith.cmpi eq, %62, %63 : vector<8x8xi32>
      %cst_41 = arith.constant 0.000000e+00 : f32
      %65 = vector.broadcast %cst_41 : f32 to vector<8x8xf32>
      %66 = arith.select %64, %61, %65 : vector<8x8xi1>, vector<8x8xf32>
      %cst_42 = arith.constant dense<0.000000e+00> : vector<8xf32>
      %67 = vector.multi_reduction <add>, %66, %cst_42 [1] : vector<8x8xf32> to vector<8xf32>
      %68 = vector.shape_cast %67 : vector<8xf32> to vector<8x1xf32>
      %c0_43 = arith.constant 0 : index
      %c0_44 = arith.constant 0 : index
      %69 = vector.load %arg11[%c0_43, %c0_44] : memref<8x1xf32, #tpu.memory_space<vmem>>, vector<8x1xf32>
      %c0_45 = arith.constant 0 : index
      %c0_46 = arith.constant 0 : index
      %70 = vector.load %arg10[%c0_45, %c0_46] : memref<1x64xf32, #tpu.memory_space<vmem>>, vector<1x64xf32>
      %71 = vector.broadcast %69 : vector<8x1xf32> to vector<8x64xf32>
      %72 = vector.broadcast %70 : vector<1x64xf32> to vector<8x64xf32>
      %73 = arith.mulf %71, %72 : vector<8x64xf32>
      %74 = vector.broadcast %68 : vector<8x1xf32> to vector<8x64xf32>
      %75 = arith.addf %73, %74 : vector<8x64xf32>
      %76 = math.sin %75 : vector<8x64xf32>
      %77 = vector.broadcast %59 : vector<8x1xf32> to vector<8x64xf32>
      %78 = arith.mulf %77, %76 : vector<8x64xf32>
      %cst_47 = arith.constant dense<0.000000e+00> : vector<64xf32>
      %79 = vector.multi_reduction <add>, %78, %cst_47 [0] : vector<8x64xf32> to vector<64xf32>
      %80 = vector.shape_cast %79 : vector<64xf32> to vector<1x64xf32>
      %c0_48 = arith.constant 0 : index
      %c0_49 = arith.constant 0 : index
      %81 = vector.load %arg13[%c0_48, %c0_49] : memref<1x64xf32, #tpu.memory_space<vmem>>, vector<1x64xf32>
      tpu.vector_store %arg13[%c0_48, %c0_49], %80 {strides = array<i32>} : memref<1x64xf32, #tpu.memory_space<vmem>>, vector<1x64xf32>,
    } else {
    }
    return
  }
  func.func @transform_0(%arg0: i32) -> (i32, i32) {
    %c0_i32 = arith.constant 0 : i32
    %c0_i32_0 = arith.constant 0 : i32
    return %arg0, %c0_i32 : i32, i32
  }
  func.func @transform_1(%arg0: i32) -> (i32, i32) {
    %c0_i32 = arith.constant 0 : i32
    %c0_i32_0 = arith.constant 0 : i32
    %c0_i32_1 = arith.constant 0 : i32
    return %c0_i32, %c0_i32_0 : i32, i32
  }
  func.func @transform_2(%arg0: i32) -> (i32, i32) {
    %c0_i32 = arith.constant 0 : i32
    %c0_i32_0 = arith.constant 0 : i32
    %c0_i32_1 = arith.constant 0 : i32
    return %c0_i32, %c0_i32_0 : i32, i32
  }
  func.func @transform_3(%arg0: i32) -> (i32, i32) {
    %c0_i32 = arith.constant 0 : i32
    %c0_i32_0 = arith.constant 0 : i32
    %c0_i32_1 = arith.constant 0 : i32
    return %c0_i32, %c0_i32_0 : i32, i32
  }
  func.func @transform_4(%arg0: i32) -> (i32, i32) {
    %c0_i32 = arith.constant 0 : i32
    %c0_i32_0 = arith.constant 0 : i32
    %c0_i32_1 = arith.constant 0 : i32
    return %c0_i32, %c0_i32_0 : i32, i32
  }
  func.func @transform_5(%arg0: i32) -> (i32, i32) {
    %c0_i32 = arith.constant 0 : i32
    %c0_i32_0 = arith.constant 0 : i32
    %c0_i32_1 = arith.constant 0 : i32
    return %c0_i32, %c0_i32_0 : i32, i32
  }
  func.func @transform_6(%arg0: i32) -> (i32, i32) {
    %c0_i32 = arith.constant 0 : i32
    %c0_i32_0 = arith.constant 0 : i32
    %c0_i32_1 = arith.constant 0 : i32
    return %c0_i32, %c0_i32_0 : i32, i32
  }
  func.func @transform_7(%arg0: i32) -> (i32, i32) {
    %c0_i32 = arith.constant 0 : i32
    %c0_i32_0 = arith.constant 0 : i32
    %c0_i32_1 = arith.constant 0 : i32
    return %c0_i32, %c0_i32_0 : i32, i32
  }
  func.func @transform_8(%arg0: i32) -> (i32, i32) {
    %c0_i32 = arith.constant 0 : i32
    %c0_i32_0 = arith.constant 0 : i32
    %c0_i32_1 = arith.constant 0 : i32
    return %c0_i32, %c0_i32_0 : i32, i32
  }
  func.func @transform_9(%arg0: i32) -> (i32, i32) {
    %c0_i32 = arith.constant 0 : i32
    %c0_i32_0 = arith.constant 0 : i32
    %c0_i32_1 = arith.constant 0 : i32
    return %c0_i32, %c0_i32_0 : i32, i32
  }
  func.func @transform_10(%arg0: i32) -> (i32, i32) {
    %c0_i32 = arith.constant 0 : i32
    %c0_i32_0 = arith.constant 0 : i32
    %c0_i32_1 = arith.constant 0 : i32
    return %c0_i32, %c0_i32_0 : i32, i32
  }
  func.func @transform_11(%arg0: i32) -> (i32, i32) {
    %c0_i32 = arith.constant 0 : i32
    %c0_i32_0 = arith.constant 0 : i32
    %c0_i32_1 = arith.constant 0 : i32
    return %c0_i32, %c0_i32_0 : i32, i32
  }
  func.func @transform_12(%arg0: i32) -> (i32, i32) {
    %c0_i32 = arith.constant 0 : i32
    %c0_i32_0 = arith.constant 0 : i32
    %c0_i32_1 = arith.constant 0 : i32
    return %c0_i32, %c0_i32_0 : i32, i32
  }
  func.func @transform_13(%arg0: i32) -> (i32, i32) {
    %c0_i32 = arith.constant 0 : i32
    %c0_i32_0 = arith.constant 0 : i32
    %c0_i32_1 = arith.constant 0 : i32
    return %c0_i32, %c0_i32_0 : i32, i32
  }
  func.func @transform_14(%arg0: i32) -> (i32, i32) {
    %c0_i32 = arith.constant 0 : i32
    %c0_i32_0 = arith.constant 0 : i32
    %c0_i32_1 = arith.constant 0 : i32
    return %c0_i32, %c0_i32_0 : i32, i32
  }
}

</mosaic_0001>

<bundles_post_ra>
// kernel: tpu_custom_call.1
= control target key start
LH: loop header
LB: loop body
LE: loop exit
PB: predicated region body
PF: predicated region fallthrough
CT: control target
= control target key end

     0   :  { %20 = vsyncpa [#allocation4], 0  ;;  %s1607_s0 = inlined_call_operand.vmem [shape: f32[16,32], index: 0, kind: input, shape index: {}]   ;;  %s1608_s1 = inlined_call_operand.vmem [shape: f32[32,64], index: 1, kind: input, shape index: {}]   ;;  %s1609_s2 = inlined_call_operand.vmem [shape: f32[1,64], index: 2, kind: input, shape index: {}]   ;;  %s1610_s3 = inlined_call_operand.vmem [shape: f32[64,64], index: 3, kind: input, shape index: {}]   ;;  %s1611_s4 = inlined_call_operand.vmem [shape: f32[1,64], index: 4, kind: input, shape index: {}]   ;;  %s1612_s5 = inlined_call_operand.vmem [shape: f32[64,8], index: 5, kind: input, shape index: {}]   ;;  %s1613_s6 = inlined_call_operand.vmem [shape: f32[1,8], index: 6, kind: input, shape index: {}]   ;;  %s1614_s7 = inlined_call_operand.vmem [shape: f32[64,8], index: 7, kind: input, shape index: {}]   ;;  %s1615_s8 = inlined_call_operand.vmem [shape: f32[1,8], index: 8, kind: input, shape index: {}]   ;;  %s1616_s9 = inlined_call_operand.vmem [shape: f32[1,64], index: 9, kind: input, shape index: {}]   ;;  %s1617_s10 = inlined_call_operand.vmem [shape: f32[8,1], index: 10, kind: input, shape index: {}]   ;;  %s1618_s11 = inlined_call_operand.vmem [shape: f32[1,8], index: 11, kind: input, shape index: {}]   ;;  %s1619_s12 = inlined_call_operand.hbm [shape: f32[1,64], index: 12, kind: output, shape index: {0}]   ;;  %s1620_s13 = inlined_call_operand.hbm [shape: f32[1,8], index: 13, kind: output, shape index: {1}]   ;;  %s1621_s14 = inlined_call_operand.hbm [shape: f32[1,8], index: 14, kind: output, shape index: {2}]  }
   0x1   :  { %21 = vsyncpa [#allocation6], 0  ;;  %s1414_s29 = smov 0  }
   0x2 LB: > { %s1420_s30 = sadd.s32 4294967295, %s1322_s29   ;;  %p1062_p0 = scmp.ge.s32.totalorder %s1322_s29, 1  ;;  %s1322_s29 = sphi %s1414_s29, %s27_s29  }
   0x3   : > { %p403_p1 = scmp.lt.s32.totalorder %s1322_s29, 3 }
   0x5   : > { %p404_p2 = pnand %p1062_p0, %p403_p1 }
   0x6   : > { %p443_p3 = scmp.lt.s32.totalorder (!%p404_p2), %s1420_s30, 1  ;;  %p1064_p4 = scmp.ne.s32.totalorder (!%p404_p2), %s1420_s30, 0 }
   0x7   : > { %407 = sbr.rel (%p404_p2) target bundleno = 945 (0x3b1), region = 68 }
   0xc   : > { %s444_s15 = scalar_select %p443_p3, %s1420_s30, 1 }
   0xd   : > { %450 = sbr.rel (%p1064_p4) target bundleno = 20 (0x14), region = 72 }
   0xe   : > { %s1063_s16 = sshll.u32 %s444_s15, 3 }
   0xf   : > { %s446_s19 = scalar_lea.vmem %s1607_s0, %s1063_s16 }
  0x12   : > { %vm451_vm0 = vcmask 516096   ;;  %v1324_v0 = vmov 0.0  }
  0x13   : > { %452 = vst.msk [vmem:[#allocation2] sm:$0x1] %vm451_vm0, %v1324_v0 }
  0x14 PF: > { %v457_v1 = vld [vmem:[%s1608_s1 + $0x18] sm:$0xff]  ;;  %v1325_v2 = vmov 0.0   ;;  %v456_v3 = vld [vmem:[%s1608_s1 + $0x10] sm:$0xff]  ;;  %vm1326_vm1 = vmmov 0   ;;  %v455_v6 = vld [vmem:[%s1608_s1 + $0x8] sm:$0xff]  ;;  %vm465_vm2 = vcmask 261120   ;;  %v631_v20 = vlaneseq }
  0x15   : > { %1118 = vmatprep.subr.mxu0 %v1325_v2  ;;  %1126 = vmatprep.mubr.msk.f32.mxu0 %vm1326_vm1, %v1325_v2  ;;  %v547_v4 = vld [vmem:[%s1610_s3 + $0x38] sm:$0xff]  ;;  %v546_v5 = vld [vmem:[%s1610_s3 + $0x30] sm:$0xff]  ;;  %v545_v7 = vld [vmem:[%s1610_s3 + $0x28] sm:$0xff]  ;;  %vm555_vm3 = vcmask 523264   ;;  %s1069_s18 = sshll.u32 %s1420_s30, 3  ;;  %vm648_vm5 = vcmask 516096  }
  0x16   : > { %1119 = vmatpush3.msra.mxu0 %v457_v1  ;;  %1129 = vmatprep.subr.mxu1 %v1325_v2  ;;  %v454_v8 = vld [vmem:[%s1608_s1] sm:$0xff]  ;;  %v543_v11 = vld [vmem:[%s1610_s3 + $0x18] sm:$0xff]  ;;  %v542_v12 = vld [vmem:[%s1610_s3 + $0x10] sm:$0xff]  ;;  %v1474_v21 = vshrl.u32 %v631_v20, 7  ;;  %v633_v22 = vstv %s1069_s18  ;;  %p1070_p5 = scmp.ne.s32.totalorder %s1420_s30, 1 }
  0x17   : > { %1120 = vmatprep.subr.mxu0 %v1325_v2  ;;  %1130 = vmatpush3.msra.mxu1 %v547_v4  ;;  %v453_v9 = vld [vmem:[%s446_s19] sm:$0xff]  ;;  %v541_v13 = vld [vmem:[%s1610_s3 + $0x8] sm:$0xff] }
  0x18   : > { %1121 = vmatpush3.msra.mxu0 %v456_v3  ;;  %1131 = vmatprep.subr.mxu1 %v1325_v2  ;;  %v544_v10 = vld [vmem:[%s1610_s3 + $0x20] sm:$0xff]  ;;  %v634_v24 = vadd.s32 %v633_v22, %v1474_v21 }
  0x19   : > { %1122 = vmatprep.subr.mxu0 %v1325_v2  ;;  %1132 = vmatpush3.msra.mxu1 %v546_v5  ;;  %v540_v14 = vld [vmem:[%s1610_s3] sm:$0xff] }
  0x1a   : > { %1123 = vmatpush3.msra.mxu0 %v455_v6  ;;  %1133 = vmatprep.subr.mxu1 %v1325_v2  ;;  %v1065_v15 = vld [vmem:[%s1609_s2] ss:$0 sm:$0xff]  ;;  %vm635_vm4 = vcmp.lt.s32.totalorder %v634_v24, 16 }
  0x1b   : > { %1124 = vmatprep.subr.mxu0 %v1325_v2  ;;  %1134 = vmatpush3.msra.mxu1 %v545_v7  ;;  %v1067_v23 = vld [vmem:[%s1611_s4] ss:$0 sm:$0xff] }
  0x1c   : > { %1125 = vmatpush3.msra.mxu0 %v454_v8  ;;  %1135 = vmatprep.subr.mxu1 %v1325_v2  ;;  %v639_v36 = vld [vmem:[#allocation2] sm:$0x1] }
  0x1d   : > { %1127 = vmatmul.mubr.msk.f32.vlgmr.msra.gmra.mxu0 %vm465_vm2, %v453_v9  ;;  %1136 = vmatpush3.msra.mxu1 %v544_v10 }
  0x1e   : > { %1137 = vmatprep.subr.mxu1 %v1325_v2  ;;  %1145 = vmatprep.mubr.msk.f32.mxu1 %vm1326_vm1, %v1325_v2 }
  0x1f   : > { %1138 = vmatpush3.msra.mxu1 %v543_v11 }
  0x20   : > { %1139 = vmatprep.subr.mxu1 %v1325_v2 }
  0x21   : > { %1140 = vmatpush3.msra.mxu1 %v542_v12 }
  0x22   : > { %1141 = vmatprep.subr.mxu1 %v1325_v2 }
  0x23   : > { %1142 = vmatpush3.msra.mxu1 %v541_v13 }
  0x24   : > { %1143 = vmatprep.subr.mxu1 %v1325_v2 }
  0x25   : > { %1144 = vmatpush3.msra.mxu1 %v540_v14 }
  0xdd   : > { %v535_v16 = vpop.f32.mrf.mxu0 }
  0xde   : > { %v536_v17 = vadd.f32 %v1065_v15, %v535_v16 }
  0xdf   : > { %v1128_v18 = vpop.f32.mrf.mxu0 }
  0xe0   : > { %v539_v19 = vmax.f32 %v536_v17, 0.0 }
  0xe2   : > { %1146 = vmatmul.mubr.msk.f32.vlgmr.msra.gmra.mxu1 %vm555_vm3, %v539_v19 }
 0x1a2   : > { %v625_v25 = vpop.f32.mrf.mxu1 }
 0x1a3   : > { %v626_v26 = vadd.f32 %v1067_v23, %v625_v25 }
 0x1a4   : > { %v1147_v27 = vpop.f32.mrf.mxu1 }
 0x1a5   : > { %v629_v28 = vmax.f32 %v626_v26, 0.0 }
 0x1a7   : > { %v638_v29 = vsel %vm635_vm4, %v629_v28, 0.0 }
 0x1a8   : > { %v640_v30 = vsel %vm555_vm3, %v638_v29, 0.0 }
 0x1a9   : > { %v641_v31 = vrot.slane %v640_v30, 4 }
 0x1ab   : > { %v642_v32 = vadd.f32 %v641_v31, %v640_v30 }
 0x1ad   : > { %v643_v33 = vrot.slane %v642_v32, 2 }
 0x1af   : > { %v644_v34 = vadd.f32 %v643_v33, %v642_v32 }
 0x1b1   : > { %v645_v35 = vrot.slane %v644_v34, 1 }
 0x1b3   : > { %v646_v37 = vadd.f32 %v645_v35, %v644_v34  ;;  %653 = sbr.rel (%p1070_p5) target bundleno = 904 (0x388), region = 76 }
 0x1b5   : > { %v647_v38 = vadd.f32 %v646_v37, %v639_v36 }
 0x1b7   : > { %649 = vst.msk [vmem:[#allocation2] sm:$0x1] %vm648_vm5, %v647_v38 }
 0x1b8   : > { %v745_v39 = vld [vmem:[%s1614_s7 + $0x38] sm:$0xff]  ;;  %v1327_v40 = vmov 0.0   ;;  %v744_v41 = vld [vmem:[%s1614_s7 + $0x30] sm:$0xff]  ;;  %vm1328_vm6 = vmmov 0   ;;  %v743_v42 = vld [vmem:[%s1614_s7 + $0x28] sm:$0xff]  ;;  %v1329_v58 = vmov 0  }
 0x1b9   : > { %1167 = vmatprep.subr.mxu1 %v1327_v40  ;;  %1183 = vmatprep.mubr.msk.f32.mxu1 %vm1328_vm6, %v1327_v40  ;;  %v663_v43 = vld [vmem:[%s1612_s5 + $0x38] sm:$0xff]  ;;  %v662_v44 = vld [vmem:[%s1612_s5 + $0x30] sm:$0xff]  ;;  %v742_v45 = vld [vmem:[%s1614_s7 + $0x20] sm:$0xff]  ;;  %v827_v60 = vand.u32 127, %v631_v20  ;;  %v824_v61 = vsub.s32 0, %v1474_v21  ;;  %vm817_vm7 = vcmask 57344  }
 0x1ba   : > { %1168 = vmatpush3.msra.mxu1 %v745_v39  ;;  %1148 = vmatprep.subr.mxu0 %v1327_v40  ;;  %v661_v46 = vld [vmem:[%s1612_s5 + $0x28] sm:$0xff]  ;;  %v741_v47 = vld [vmem:[%s1614_s7 + $0x18] sm:$0xff]  ;;  %v660_v48 = vld [vmem:[%s1612_s5 + $0x20] sm:$0xff]  ;;  %vm830_vm9 = vcmask 64512   ;;  %v1330_v30 = vmov 2102212464  }
 0x1bb   : > { %1169 = vmatprep.subr.mxu1 %v1327_v40  ;;  %1164 = vmatprep.mubr.msk.f32.mxu0 %vm1328_vm6, %v1327_v40  ;;  %v740_v49 = vld [vmem:[%s1614_s7 + $0x10] sm:$0xff]  ;;  %v659_v50 = vld [vmem:[%s1612_s5 + $0x18] sm:$0xff]  ;;  %v739_v52 = vld [vmem:[%s1614_s7 + $0x8] sm:$0xff]  ;;  %vm828_vm8 = vcmp.eq.s32.totalorder %v1474_v21, %v827_v60  ;;  %v1331_v32 = vmov 920167782  }
 0x1bc   : > { %1170 = vmatpush3.msra.mxu1 %v744_v41  ;;  %1149 = vmatpush3.msra.mxu0 %v663_v43  ;;  %v658_v53 = vld [vmem:[%s1612_s5 + $0x10] sm:$0xff]  ;;  %v738_v54 = vld [vmem:[%s1614_s7] sm:$0xff]  ;;  %v657_v56 = vld [vmem:[%s1612_s5 + $0x8] sm:$0xff]  ;;  %v1332_v36 = vmov 1326507024  }
 0x1bd   : > { %1171 = vmatprep.subr.mxu1 %v1327_v40  ;;  %1150 = vmatprep.subr.mxu0 %v1327_v40  ;;  %v656_v57 = vld [vmem:[%s1612_s5] sm:$0xff]  ;;  %v1333_v38 = vmov 683565275   ;;  %v1335_v43 = vmov 2131351028  }
 0x1be   : > { %1172 = vmatpush3.msra.mxu1 %v743_v42  ;;  %1151 = vmatpush3.msra.mxu0 %v662_v44  ;;  %v654_v51 = vld [vmem:[#allocation2] sm:$0x1] }
 0x1bf   : > { %1173 = vmatprep.subr.mxu1 %v1327_v40  ;;  %1152 = vmatprep.subr.mxu0 %v1327_v40  ;;  %v655_v55 = vmul.f32 0.0625, %v654_v51  ;;  %v746_v59 = vld [vmem:[%s1615_s8] sm:$0x1] }
 0x1c0   : > { %1174 = vmatpush3.msra.mxu1 %v742_v45  ;;  %1153 = vmatpush3.msra.mxu0 %v661_v46  ;;  %v664_v63 = vld [vmem:[%s1613_s6] sm:$0x1] }
 0x1c1   : > { %1175 = vmatprep.subr.mxu1 %v1327_v40  ;;  %1154 = vmatprep.subr.mxu0 %v1327_v40  ;;  %v820_v3 = vld [vmem:[%s1618_s11] sm:$0x1] }
 0x1c2   : > { %1176 = vmatpush3.msra.mxu1 %v741_v47  ;;  %1155 = vmatpush3.msra.mxu0 %v660_v48  ;;  %v842_v13 = vld [vmem:[%s1617_s10] sm:$0xff] }
 0x1c3   : > { %1177 = vmatprep.subr.mxu1 %v1327_v40  ;;  %1156 = vmatprep.subr.mxu0 %v1327_v40  ;;  %v1073_v15 = vld [vmem:[%s1616_s9] ss:$0 sm:$0xff] }
 0x1c4   : > { %1178 = vmatpush3.msra.mxu1 %v740_v49  ;;  %1157 = vmatpush3.msra.mxu0 %v659_v50 }
 0x1c5   : > { %1179 = vmatprep.subr.mxu1 %v1327_v40  ;;  %1158 = vmatprep.subr.mxu0 %v1327_v40 }
 0x1c6   : > { %1180 = vmatpush3.msra.mxu1 %v739_v52  ;;  %1159 = vmatpush3.msra.mxu0 %v658_v53 }
 0x1c7   : > { %1181 = vmatprep.subr.mxu1 %v1327_v40  ;;  %1160 = vmatprep.subr.mxu0 %v1327_v40 }
 0x1c8   : > { %1182 = vmatpush3.msra.mxu1 %v738_v54  ;;  %1161 = vmatpush3.msra.mxu0 %v657_v56 }
 0x1c9   : > { %1184 = vmatmul.mubr.msk.f32.vlgmr.msra.gmra.mxu1 %vm555_vm3, %v655_v55  ;;  %1162 = vmatprep.subr.mxu0 %v1327_v40  ;;  %v1334_v40 = vmov 2475754826  }
 0x1ca   : > { %1163 = vmatpush3.msra.mxu0 %v656_v57  ;;  %1231 = vset.pattern.permute.xlu0 %v1329_v58 }
 0x1cb   : > { %1165 = vmatmul.mubr.msk.f32.vlgmr.msra.gmra.mxu0 %vm555_vm3, %v655_v55 }
 0x289   : > { %v813_v62 = vpop.f32.mrf.mxu1 }
 0x28a   : > { %v814_v0 = vadd.f32 %v813_v62, %v746_v59 }
 0x28b   : > { %v1185_v1 = vpop.f32.mrf.mxu1  ;;  %v734_v2 = vpop.f32.mrf.mxu0 }
 0x28c   : > { %819 = vst.msk [vmem:[#allocation7] sm:$0x1] %vm817_vm7, %v814_v0  ;;  %v837_v4 = vrot.slane %v814_v0, %v824_v61  ;;  %v735_v5 = vadd.f32 %v734_v2, %v664_v63 }
 0x28d   : > { %v1166_v6 = vpop.f32.mrf.mxu0 }
 0x28e   : > { %v838_v7 = vsel %vm828_vm8, %v837_v4, 0.0  ;;  %818 = vst.msk [vmem:[#allocation5] sm:$0x1] %vm817_vm7, %v735_v5  ;;  %v821_v8 = vmul.f32 %v820_v3, %v735_v5 }
 0x28f   : > { %v839_v9 = vsel %vm830_vm9, %v838_v7, 0.0 }
 0x290   : > { %840 = vadd.xlane.f32.xlu0 %v839_v9  ;;  %v825_v10 = vrot.slane %v821_v8, %v824_v61 }
 0x292   : > { %v829_v11 = vsel %vm828_vm8, %v825_v10, 0.0 }
 0x293   : > { %v831_v12 = vsel %vm830_vm9, %v829_v11, 0.0 }
 0x294   : > { %832 = vadd.xlane.f32.xlu1 %v831_v12 }
 0x2a6   : > { %846 = vperm.xlu0 %1231, %v842_v13  }
 0x319   : > { %v841_v14 = vpop.xlane.xlu0 %840 }
 0x321   : > { %v847_v16 = vpop.permute.xlu0 %846 }
 0x322   : > { %v855_v17 = vmul.f32 %v1073_v15, %v847_v16 }
 0x324   : > { %v1551_v18 = vadd.f32 %v855_v17, %v841_v14 }
 0x326   : > { %v860_v19 = vand.u32 2139095040, %v1551_v18  ;;  %v857_v20 = vand.u32 2147483647, %v1551_v18  ;;  %vm859_vm1 = vcmp.lt.s32.totalorder %v1551_v18, 0  ;;  %vm949_vm8 = vweird.f32 %v1551_v18 }
 0x328   : > { %v861_v21 = vshrl.u32 %v860_v19, 23  ;;  %v864_v23 = vand.u32 8388607, %v857_v20  ;;  %vm858_vm2 = vcmp.le.f32.partialorder %v857_v20, 0.7853982 }
 0x32a   : > { %v1074_v22 = vadd.s32 4294967169, %v861_v21  ;;  %v865_v26 = vor.u32 8388608, %v864_v23 }
 0x32c   : > { %v867_v24 = vadd.s32 1, %v1074_v22  ;;  %v905_v34 = vshll.u32 %v865_v26, 8 }
 0x32e   : > { %vm868_vm10 = vcmp.gt.s32.totalorder %v867_v24, 0 }
 0x32f   : > { %v869_v25 = vsel %vm868_vm10, %v867_v24, 0 }
 0x330   : > { %v871_v27 = vand.u32 31, %v869_v25  ;;  %v870_v28 = vshrl.u32 %v869_v25, 5 }
 0x332   : > { %v872_v29 = vsub.s32 32, %v871_v27  ;;  %v883_v31 = vshll.u32 %v1330_v30, %v871_v27  ;;  %v886_v33 = vshll.u32 %v1331_v32, %v871_v27  ;;  %v874_v39 = vshll.u32 %v1333_v38, %v871_v27 }
 0x333   : > { %v877_v42 = vshll.u32 %v1334_v40, %v871_v27  ;;  %v880_v45 = vshll.u32 %v1335_v43, %v871_v27  ;;  %vm892_vm11 = vcmp.lt.s32.totalorder %v870_v28, 4  ;;  %vm889_vm12 = vcmp.lt.s32.totalorder %v870_v28, 1 }
 0x334   : > { %v884_v35 = vshrl.u32 %v1331_v32, %v872_v29  ;;  %v887_v37 = vshrl.u32 %v1332_v36, %v872_v29  ;;  %v875_v41 = vshrl.u32 %v1334_v40, %v872_v29  ;;  %v878_v44 = vshrl.u32 %v1335_v43, %v872_v29 }
 0x335   : > { %v881_v46 = vshrl.u32 %v1330_v30, %v872_v29  ;;  %v873_v50 = vshrl.u32 %v1333_v38, %v872_v29  ;;  %vm890_vm13 = vcmp.lt.s32.totalorder %v870_v28, 2  ;;  %vm891_vm14 = vcmp.lt.s32.totalorder %v870_v28, 3 }
 0x336   : > { %v885_v47 = vor.u32 %v884_v35, %v883_v31  ;;  %v888_v48 = vor.u32 %v887_v37, %v886_v33  ;;  %v876_v49 = vor.u32 %v875_v41, %v874_v39  ;;  %v879_v51 = vor.u32 %v878_v44, %v877_v42 }
 0x337   : > { %v882_v52 = vor.u32 %v881_v46, %v880_v45  ;;  %v833_v46 = vpop.xlane.xlu1 %832 }
 0x338   : > { %v898_v53 = vsel %vm892_vm11, %v885_v47, 920167782  ;;  %v902_v54 = vsel %vm892_vm11, %v888_v48, 1326507024  ;;  %v897_v56 = vsel %vm889_vm12, %v876_v49, %v879_v51  ;;  %v893_v59 = vsel %vm889_vm12, %v873_v50, %v876_v49 }
 0x339   : > { %v894_v55 = vsel %vm892_vm11, %v882_v52, 2102212464  ;;  %v899_v57 = vsel %vm891_vm14, %v882_v52, %v898_v53  ;;  %v901_v58 = vsel %vm889_vm12, %v879_v51, %v882_v52  ;;  %v903_v62 = vsel %vm891_vm14, %v885_v47, %v902_v54 }
 0x33a   : > { %v895_v60 = vsel %vm891_vm14, %v879_v51, %v894_v55  ;;  %v900_v61 = vsel %vm890_vm13, %v897_v56, %v899_v57  ;;  %v904_v63 = vsel %vm890_vm13, %v901_v58, %v903_v62 }
 0x33b   : > { %v1557_v0 = vmul.u32.u64.low %v905_v34, %v900_v61  ;;  %v1558_v1 = vmul.u32.u64.high %v905_v34, %v900_v61, %v1557_v0  ;;  %v1560_v2 = vmul.u32.u64.low %v905_v34, %v904_v63  ;;  %v1561_v3 = vmul.u32.u64.high %v905_v34, %v904_v63, %v1560_v2 }
 0x33c   : > { %v896_v4 = vsel %vm890_vm13, %v893_v59, %v895_v60 }
 0x33d   : > { %v915_v5 = vadd.s32 1, %v1558_v1  ;;  %v912_v6 = vmul.u32 %v905_v34, %v896_v4  ;;  %vm914_vm15 = vc.u32 %v1561_v3, %v1557_v0  ;;  %v913_v19 = vadd.s32 %v1557_v0, %v1561_v3 }
 0x33f   : > { %v916_v7 = vsel %vm914_vm15, %v915_v5, %v1558_v1 }
 0x340   : > { %v917_v8 = vadd.s32 %v916_v7, %v912_v6 }
 0x342   : > { %v918_v9 = vadd.s32 536870912, %v917_v8 }
 0x344   : > { %v919_v10 = vshrl.u32 %v918_v9, 30 }
 0x346   : > { %v920_v11 = vshll.u32 %v919_v10, 30  ;;  %v943_v33 = vsub.s32 4, %v919_v10 }
 0x348   : > { %v921_v12 = vsub.s32 %v917_v8, %v920_v11  ;;  %v944_v36 = vsel %vm859_vm1, %v943_v33, %v919_v10 }
 0x349   : > { %v946_v37 = vsel %vm858_vm2, 0, %v944_v36 }
 0x34a   : > { %v923_v13 = vsub.s32 0, %v921_v12  ;;  %v950_v38 = vadd.s32 3, %v946_v37 }
 0x34c   : > { %v1075_v14 = vmin.u32 %v923_v13, %v921_v12  ;;  %v951_v39 = vand.u32 3, %v950_v38 }
 0x34e   : > { %v925_v15 = vclz %v1075_v14  ;;  %vm956_vm4 = vcmp.eq.s32.totalorder %v951_v39, 2  ;;  %vm953_vm6 = vcmp.eq.s32.totalorder %v951_v39, 0  ;;  %vm952_vm7 = vcmp.lt.s32.totalorder %v951_v39, 2 }
 0x350   : > { %v1076_v16 = vadd.s32 4294967294, %v925_v15 }
 0x352   : > { %vm1077_vm0 = vcmp.lt.s32.totalorder %v1076_v16, 0 }
 0x353   : > { %v928_v17 = vsel %vm1077_vm0, 0, %v1076_v16 }
 0x354   : > { %v929_v21 = vsub.s32 32, %v928_v17  ;;  %v933_v22 = vsub.s32 4294967266, %v928_v17  ;;  %v930_v23 = vshll.u32 %v921_v12, %v928_v17 }
 0x356   : > { %v931_v24 = vshrl.u32 %v913_v19, %v929_v21  ;;  %v934_v25 = vadd.s32 127, %v933_v22 }
 0x358   : > { %v932_v26 = vor.u32 %v931_v24, %v930_v23  ;;  %v935_v27 = vshll.u32 %v934_v25, 23 }
 0x35a   : > { %v936_v28 = vor.u32 4788187, %v935_v27  ;;  %v939_v30 = vcvt.s32.f32 %v932_v26 }
 0x35c   : > { %v937_v29 = vand.u32 2147483647, %v936_v28 }
 0x35e   : > { %v940_v31 = vmul.f32 %v939_v30, %v937_v29 }
 0x360   : > { %v941_v32 = vxor.u32 2147483648, %v940_v31 }
 0x362   : > { %v942_v34 = vsel %vm859_vm1, %v941_v32, %v940_v31 }
 0x363   : > { %v945_v35 = vsel %vm858_vm2, %v1551_v18, %v942_v34 }
 0x364   : > { %1232 = vcosq.f32 %v945_v35 }
 0x365   : > { %1234 = vsinq.f32 %v945_v35 }
 0x371   : > { %v1233_v40 = vpop.eup %1232 }
 0x372   : > { %v1235_v41 = vpop.eup %1234  ;;  %v957_v42 = vxor.u32 2147483648, %v1233_v40 }
 0x373   : > { %v954_v43 = vxor.u32 2147483648, %v1235_v41 }
 0x374   : > { %v958_v44 = vsel %vm956_vm4, %v957_v42, %v1235_v41 }
 0x375   : > { %v955_v45 = vsel %vm953_vm6, %v1233_v40, %v954_v43 }
 0x376   : > { %v959_v20 = vsel %vm952_vm7, %v955_v45, %v958_v44 }
 0x377   : > { %v960_v47 = vsel %vm949_vm8, nan, %v959_v20 }
 0x378   : > { %v961_v48 = vmul.f32 %v960_v47, %v833_v46 }
 0x37a   : > { %v962_v49 = vsel %vm555_vm3, %v961_v48, 0.0 }
 0x37b   : > { %v963_v50 = vrot.slane %v962_v49, 4 }
 0x37d   : > { %v964_v51 = vadd.f32 %v963_v50, %v962_v49 }
 0x37f   : > { %v965_v52 = vrot.slane %v964_v51, 2 }
 0x381   : > { %v966_v53 = vadd.f32 %v965_v52, %v964_v51 }
 0x383   : > { %v967_v54 = vrot.slane %v966_v53, 1 }
 0x385   : > { %v968_v55 = vadd.f32 %v967_v54, %v966_v53 }
 0x387   : > { %969 = vst.msk [vmem:[#allocation3] sm:$0x1] %vm648_vm5, %v968_v55 }
 0x388 PF: > { %p1202_p6 = scmp.eq.s32.totalorder %s1420_s30, 1  ;;  %s1336_s22 = smov [#allocation5]  }
 0x389   : > { %s988_s23 = sshll.u32 %s1336_s22, 4  ;;  %s1337_s24 = smov [#allocation3]   ;;  %s989_s23 = int_to_ptr.vmem [resolvable:$true] %s988_s23 }
 0x38a   : > { %s977_s19 = sshll.u32 %s1337_s24, 4  ;;  %s1236_s25 = scalar_lea.vmem %s989_s23, 16  ;;  %s978_s19 = int_to_ptr.vmem [resolvable:$true] %s977_s19 }
 0x38b   : > { %p1237_p7 = scmp.ne.s32.totalorder %s989_s23, %s1236_s25  ;;  %s1242_s26 = scalar_lea.vmem %s989_s23, 32 }
 0x38c   : > { %p1243_p10 = scmp.lt.s32.totalorder %s989_s23, %s989_s23  ;;  %p1244_p11 = scmp.lt.s32.totalorder %s1242_s26, %s1236_s25 }
 0x38d   : > { %p1238_p8 = pnand %p1237_p7, %p1202_p6 }
 0x38e   : > { %p1245_p12 = por %p1244_p11, %p1243_p10 }
 0x38f   : > { %p1239_p9 = pneg %p1238_p8 }
 0x391   : > { %p1246_p13 = pnand %p1245_p12, %p1239_p9 }
 0x393   : > { %1249 = shalt.err (!%p1246_p13)
}
 0x394   : > { %1193 = dma.vmem_to_hbm [thread:$0]  (%p1202_p6), %s989_s23, 16, %s1620_s13, [#allocation6]  }
 0x395   : > { %s1260_s15 = scalar_lea.vmem %s978_s19, 16  ;;  %s1266_s16 = scalar_lea.vmem %s978_s19, 32 }
 0x396   : > { %p1261_p0 = scmp.ne.s32.totalorder %s978_s19, %s1260_s15  ;;  %p1267_p3 = scmp.lt.s32.totalorder %s978_s19, %s978_s19 }
 0x397   : > { %p1268_p4 = scmp.lt.s32.totalorder %s1266_s16, %s1260_s15 }
 0x398   : > { %p1262_p1 = pnand %p1261_p0, %p1202_p6 }
 0x399   : > { %p1269_p5 = por %p1268_p4, %p1267_p3 }
 0x39a   : > { %p1263_p2 = pneg %p1262_p1 }
 0x39c   : > { %p1270_p7 = pnand %p1269_p5, %p1263_p2 }
 0x39e   : > { %1273 = shalt.err (!%p1270_p7)
}
 0x39f   : > { %1191 = dma.vmem_to_hbm [thread:$0]  (%p1202_p6), %s978_s19, 16, %s1619_s12, [#allocation4]  }
 0x3a0   : > { %s1338_s20 = smov [#allocation7]  }
 0x3a1   : > { %s999_s21 = sshll.u32 %s1338_s20, 4  ;;  %s1000_s21 = int_to_ptr.vmem [resolvable:$true] %s999_s21 }
 0x3a2   : > { %s1284_s22 = scalar_lea.vmem %s1000_s21, 16  ;;  %s1290_s23 = scalar_lea.vmem %s1000_s21, 32 }
 0x3a3   : > { %p1285_p8 = scmp.ne.s32.totalorder %s1000_s21, %s1284_s22  ;;  %p1291_p11 = scmp.lt.s32.totalorder %s1000_s21, %s1000_s21 }
 0x3a4   : > { %p1292_p12 = scmp.lt.s32.totalorder %s1290_s23, %s1284_s22 }
 0x3a5   : > { %p1286_p9 = pnand %p1285_p8, %p1202_p6 }
 0x3a6   : > { %p1293_p13 = por %p1292_p12, %p1291_p11 }
 0x3a7   : > { %p1287_p10 = pneg %p1286_p9 }
 0x3a9   : > { %p1294_p0 = pnand %p1293_p13, %p1287_p10 }
 0x3ab   : > { %1297 = shalt.err (!%p1294_p0)
}
 0x3ac   : > { %1195 = dma.vmem_to_hbm [thread:$0]  (%p1202_p6), %s1000_s21, 16, %s1621_s14, [#allocation6]  }
 0x3ad   : > { %1313 = dma.done.wait (%p1202_p6), [#allocation4], 16  }
 0x3ae   : > { %1315 = vsyncadd (%p1202_p6), [#allocation4], 4294967280 }
 0x3af   : > { %1317 = dma.done.wait (%p1202_p6), [#allocation6], 32  }
 0x3b0   : > { %1319 = vsyncadd (%p1202_p6), [#allocation6], 4294967264 }
 0x3b1 PF: > { %s27_s29 = sadd.s32 1, %s1322_s29  }
 0x3b2   : > { %p24_p1 = scmp.ge.s32.totalorder %s27_s29, 4  }
 0x3b4   :  { %26 = sbr.rel (!%p24_p1) target bundleno = 2 (0x2), region = 119 }
 0x3b9   :  { %1020 = vsyncpa [#allocation4], 1 }
 0x3ba   :  { %1022 = vsyncpa [#allocation4 + $0x1], 1 }
 0x3bb   :  { %1023 = vsyncpa [#allocation6], 1 }

</bundles_post_ra>
